<compile_context>
chip_gen: v7x
topology: tpu7x:2x2x1
jax: 0.10.0
libtpu: 0.0.40
codegen_flags: <defaults>
</compile_context>

<pallas_src>
import functools

import jax
import jax.numpy as jnp
from jax import lax
from jax.experimental import pallas as pl
from jax.experimental.pallas import tpu as pltpu


def _global_mean_pool_kernel(batch_ref, x_ref, out_ref, acc_ref, cnt_ref,
                             *, n_valid: int):
    """Grid axes: (F-tile j [parallel], node-tile k [arbitrary/reduction])."""
    k = pl.program_id(1)  # node-tile index (reduction axis, innermost)

    @pl.when(k == 0)
    def _init():
        acc_ref[...] = jnp.zeros_like(acc_ref)
        cnt_ref[...] = jnp.zeros_like(cnt_ref)

    num_graphs = acc_ref.shape[0]
    tile_n = batch_ref.shape[1]

    # one_hot[g, n] = 1 iff node n of this tile belongs to graph g.
    # batch was padded (wrapper-side, tiny) with id == num_graphs, so padded
    # nodes match no row -> contribute to neither sums nor counts.
    b_ids = batch_ref[...]                                       # (1, tile_n)
    graph_ids = lax.broadcasted_iota(jnp.int32, (num_graphs, tile_n), 0)
    one_hot = (graph_ids == b_ids)                               # bool (B, tile_n)

    # x is NOT padded in HBM; the (possibly partial) last node tile contains
    # stale VMEM rows past n_valid.  Zero them so garbage (incl. NaN/Inf)
    # cannot leak through the matmul.  Statically a no-op when N % tile_n == 0.
    x_tile = x_ref[...]                                          # (tile_n, tile_f)
    if n_valid % tile_n != 0:
        row = lax.broadcasted_iota(jnp.int32, (tile_n, 1), 0) + k * tile_n
        x_tile = jnp.where(row < n_valid, x_tile, jnp.zeros_like(x_tile))

    # Partial per-graph feature sums on the MXU (native dtype in, f32 out).
    acc_ref[...] += jnp.dot(one_hot.astype(x_tile.dtype), x_tile,
                            preferred_element_type=jnp.float32)
    # Partial per-graph node counts (XLU reduce; slack next to the HBM stream).
    cnt_ref[...] += jnp.sum(one_hot.astype(jnp.float32), axis=1, keepdims=True)

    @pl.when(k == pl.num_programs(1) - 1)
    def _finalize():
        denom = jnp.maximum(cnt_ref[...], 1.0)  # guard empty graphs
        out_ref[...] = (acc_ref[...] / denom).astype(out_ref.dtype)


def global_mean_pool(x, batch, num_graphs, *, tile_n=1024):
    """Pallas segment-mean.  x: [N, F], batch: [N] int -> [B, F] (x.dtype)."""
    n, f = x.shape

    # F tiling: two lane-dense slabs when wide enough (v7x 2-TC sharding via
    # the "parallel" axis); otherwise a single full-F block.  We deliberately
    # do NOT pad F to 128 in the wrapper: that would re-introduce a full HBM
    # copy of x, which costs more than the lane-sparse accumulator it fixes.
    if f >= 256 and f % 256 == 0:
        tile_f = f // 2
    else:
        tile_f = f

    # Node tiling: big tiles amortize per-step pipeline overhead; keep a
    # multiple of 256 to fully feed the v6e/v7x 256-deep MXU contraction,
    # but never (much) larger than N itself.
    round_up = lambda a, m: -(-a // m) * m
    tile_n = max(256, min(int(tile_n), round_up(n, 256)))
    tile_n = (tile_n // 256) * 256

    # VMEM budget: 2x double-buffered x/batch/out tiles + resident f32
    # accumulator; stay well under v7x's 64 MiB physical VMEM.
    def vmem_need(tn):
        x_tile = tn * tile_f * x.dtype.itemsize
        b_tile = tn * 4
        out_blk = num_graphs * tile_f * x.dtype.itemsize
        scratch = num_graphs * tile_f * 4 + num_graphs * 128 * 4
        return 2 * (x_tile + b_tile + out_blk) + scratch

    VMEM_BUDGET = 40 << 20
    while vmem_need(tile_n) > VMEM_BUDGET and tile_n > 256:
        tile_n -= 256
    vmem_limit = int(min(max(vmem_need(tile_n) + (4 << 20), 32 << 20), 48 << 20))

    n_pad = round_up(n, tile_n)
    # Only the (tiny) batch vector is padded; x stays untouched in HBM.
    batch_p = jnp.pad(batch.astype(jnp.int32), (0, n_pad - n),
                      constant_values=num_graphs).reshape(1, n_pad)

    grid = (f // tile_f, n_pad // tile_n)
    kernel = functools.partial(_global_mean_pool_kernel, n_valid=n)

    out = pl.pallas_call(
        kernel,
        out_shape=jax.ShapeDtypeStruct((num_graphs, f), x.dtype),
        grid_spec=pltpu.PrefetchScalarGridSpec(
            num_scalar_prefetch=0,
            grid=grid,
            in_specs=[
                pl.BlockSpec((1, tile_n), lambda j, k: (0, k)),        # batch ids
                pl.BlockSpec((tile_n, tile_f), lambda j, k: (k, j)),   # node feats
            ],
            out_specs=pl.BlockSpec((num_graphs, tile_f), lambda j, k: (0, j)),
            scratch_shapes=[
                pltpu.VMEM((num_graphs, tile_f), jnp.float32),  # f32 sum accumulator
                pltpu.VMEM((num_graphs, 1), jnp.float32),       # per-graph counts
            ],
        ),
        compiler_params=pltpu.CompilerParams(
            dimension_semantics=("parallel", "arbitrary"),
            vmem_limit_bytes=vmem_limit,
        ),
    )(batch_p, x)
    return out


class ReadoutLayer:
    """JAX/Pallas equivalent of the PyTorch ReadoutLayer (no parameters)."""

    def __call__(self, x, batch, num_graphs):
        return global_mean_pool(x, batch, num_graphs)


if __name__ == "__main__":
    key = jax.random.PRNGKey(0)
    k_x, k_b = jax.random.split(key)

    N, F, B = 200, 32, 4                       # 200 nodes, 32 features, 4 graphs
    x = jax.random.normal(k_x, (N, F), dtype=jnp.float32)
    batch = jax.random.randint(k_b, (N,), 0, B, dtype=jnp.int32)

    layer = ReadoutLayer()
    out = layer(x, batch, B)
    out = jax.block_until_ready(out)

    # Pure-JAX reference (segment mean).
    sums = jax.ops.segment_sum(x, batch, num_segments=B)
    counts = jax.ops.segment_sum(jnp.ones((N,), jnp.float32), batch,
                                 num_segments=B)
    ref = sums / jnp.maximum(counts, 1.0)[:, None]

    assert out.shape == (B, F)
    assert jnp.allclose(out, ref, atol=1e-5, rtol=1e-5), "mismatch vs reference"
    print("KERNEL_OK")
</pallas_src>

<mosaic_0001>
module attributes {stable_mosaic.version = 11 : i64} {
  func.func @_global_mean_pool_kernel(%arg0: i32, %arg1: i32, %arg2: memref<1x256xi32, #tpu.memory_space<vmem>>, %arg3: memref<256x32xf32, #tpu.memory_space<vmem>>, %arg4: memref<4x32xf32, #tpu.memory_space<vmem>>, %arg5: memref<4x32xf32, #tpu.memory_space<vmem>>, %arg6: memref<4x1xf32, #tpu.memory_space<vmem>>) attributes {dimension_semantics = [#tpu.dimension_semantics<parallel>, #tpu.dimension_semantics<arbitrary>], iteration_bounds = array<i64: 1, 1>, scalar_prefetch = 0 : i64, scratch_operands = 2 : i64, tpu.core_type = #tpu.core_type<tc>, window_params = [{transform_indices = @transform_0, window_bounds = array<i64: 1, 256>}, {transform_indices = @transform_1, window_bounds = array<i64: 256, 32>}, {transform_indices = @transform_2, window_bounds = array<i64: 4, 32>}]} {
    %c0_i32 = arith.constant 0 : i32
    %0 = arith.cmpi eq, %arg1, %c0_i32 : i32
    %1 = arith.extui %0 : i1 to i32
    %c0_i32_0 = arith.constant 0 : i32
    %2 = arith.cmpi ne, %1, %c0_i32_0 : i32
    scf.if %2 {
      %cst_16 = arith.constant 0.000000e+00 : f32
      %34 = vector.broadcast %cst_16 : f32 to vector<4x32xf32>
      %c0_17 = arith.constant 0 : index
      %c0_18 = arith.constant 0 : index
      %35 = vector.load %arg5[%c0_17, %c0_18] : memref<4x32xf32, #tpu.memory_space<vmem>>, vector<4x32xf32>
      tpu.vector_store %arg5[%c0_17, %c0_18], %34 {strides = array<i32>} : memref<4x32xf32, #tpu.memory_space<vmem>>, vector<4x32xf32>,
      %cst_19 = arith.constant 0.000000e+00 : f32
      %36 = vector.broadcast %cst_19 : f32 to vector<4x1xf32>
      %c0_20 = arith.constant 0 : index
      %c0_21 = arith.constant 0 : index
      %37 = vector.load %arg6[%c0_20, %c0_21] : memref<4x1xf32, #tpu.memory_space<vmem>>, vector<4x1xf32>
      tpu.vector_store %arg6[%c0_20, %c0_21], %36 {strides = array<i32>} : memref<4x1xf32, #tpu.memory_space<vmem>>, vector<4x1xf32>,
    } else {
    }
    %c0 = arith.constant 0 : index
    %c0_1 = arith.constant 0 : index
    %3 = vector.load %arg2[%c0, %c0_1] : memref<1x256xi32, #tpu.memory_space<vmem>>, vector<1x256xi32>
    %4 = tpu.iota {dimensions = array<i32: 0>} : vector<4x256xi32>
    %5 = vector.broadcast %3 : vector<1x256xi32> to vector<4x256xi32>
    %6 = arith.cmpi eq, %4, %5 : vector<4x256xi32>
    %c0_2 = arith.constant 0 : index
    %c0_3 = arith.constant 0 : index
    %7 = vector.load %arg3[%c0_2, %c0_3] : memref<256x32xf32, #tpu.memory_space<vmem>>, vector<256x32xf32>
    %8 = tpu.iota {dimensions = array<i32: 0>} : vector<256x1xi32>
    %c256_i32 = arith.constant 256 : i32
    %9 = arith.muli %arg1, %c256_i32 : i32
    %10 = vector.broadcast %9 : i32 to vector<256x1xi32>
    %11 = arith.addi %8, %10 : vector<256x1xi32>
    %c200_i32 = arith.constant 200 : i32
    %12 = vector.broadcast %c200_i32 : i32 to vector<256x1xi32>
    %13 = arith.cmpi slt, %11, %12 : vector<256x1xi32>
    %cst = arith.constant 0.000000e+00 : f32
    %14 = vector.broadcast %cst : f32 to vector<256x32xf32>
    %15 = vector.shape_cast %13 : vector<256x1xi1> to vector<256x1xi1>
    %16 = vector.broadcast %15 : vector<256x1xi1> to vector<256x32xi1>
    %17 = arith.select %16, %7, %14 : vector<256x32xi1>, vector<256x32xf32>
    %c0_4 = arith.constant 0 : index
    %c0_5 = arith.constant 0 : index
    %18 = vector.load %arg5[%c0_4, %c0_5] : memref<4x32xf32, #tpu.memory_space<vmem>>, vector<4x32xf32>
    %19 = arith.extui %6 : vector<4x256xi1> to vector<4x256xi32>
    %20 = arith.sitofp %19 : vector<4x256xi32> to vector<4x256xf32>
    %cst_6 = arith.constant dense<0.000000e+00> : vector<4x32xf32>
    %21 = tpu.matmul %20, %17, %cst_6 {dimension_numbers = #tpu.dot_dimension_numbers<[1], [0], [0], [1], [0, 0, 1, 1], [], []>} : vector<4x256xf32>, vector<256x32xf32>, vector<4x32xf32> -> vector<4x32xf32>
    %22 = arith.addf %18, %21 : vector<4x32xf32>
    %c0_7 = arith.constant 0 : index
    %c0_8 = arith.constant 0 : index
    %23 = vector.load %arg5[%c0_7, %c0_8] : memref<4x32xf32, #tpu.memory_space<vmem>>, vector<4x32xf32>
    tpu.vector_store %arg5[%c0_7, %c0_8], %22 {strides = array<i32>} : memref<4x32xf32, #tpu.memory_space<vmem>>, vector<4x32xf32>,
    %c0_9 = arith.constant 0 : index
    %c0_10 = arith.constant 0 : index
    %24 = vector.load %arg6[%c0_9, %c0_10] : memref<4x1xf32, #tpu.memory_space<vmem>>, vector<4x1xf32>
    %25 = arith.extui %6 : vector<4x256xi1> to vector<4x256xi32>
    %26 = arith.sitofp %25 : vector<4x256xi32> to vector<4x256xf32>
    %cst_11 = arith.constant dense<0.000000e+00> : vector<4xf32>
    %27 = vector.multi_reduction <add>, %26, %cst_11 [1] : vector<4x256xf32> to vector<4xf32>
    %28 = vector.shape_cast %27 : vector<4xf32> to vector<4x1xf32>
    %29 = arith.addf %24, %28 : vector<4x1xf32>
    %c0_12 = arith.constant 0 : index
    %c0_13 = arith.constant 0 : index
    %30 = vector.load %arg6[%c0_12, %c0_13] : memref<4x1xf32, #tpu.memory_space<vmem>>, vector<4x1xf32>
    tpu.vector_store %arg6[%c0_12, %c0_13], %29 {strides = array<i32>} : memref<4x1xf32, #tpu.memory_space<vmem>>, vector<4x1xf32>,
    %c0_i32_14 = arith.constant 0 : i32
    %31 = arith.cmpi eq, %arg1, %c0_i32_14 : i32
    %32 = arith.extui %31 : i1 to i32
    %c0_i32_15 = arith.constant 0 : i32
    %33 = arith.cmpi ne, %32, %c0_i32_15 : i32
    scf.if %33 {
      %c0_16 = arith.constant 0 : index
      %c0_17 = arith.constant 0 : index
      %34 = vector.load %arg6[%c0_16, %c0_17] : memref<4x1xf32, #tpu.memory_space<vmem>>, vector<4x1xf32>
      %cst_18 = arith.constant 1.000000e+00 : f32
      %35 = vector.broadcast %cst_18 : f32 to vector<4x1xf32>
      %36 = arith.maximumf %34, %35 : vector<4x1xf32>
      %c0_19 = arith.constant 0 : index
      %c0_20 = arith.constant 0 : index
      %37 = vector.load %arg5[%c0_19, %c0_20] : memref<4x32xf32, #tpu.memory_space<vmem>>, vector<4x32xf32>
      %38 = vector.broadcast %36 : vector<4x1xf32> to vector<4x32xf32>
      %39 = arith.divf %37, %38 : vector<4x32xf32>
      %c0_21 = arith.constant 0 : index
      %c0_22 = arith.constant 0 : index
      %40 = vector.load %arg4[%c0_21, %c0_22] : memref<4x32xf32, #tpu.memory_space<vmem>>, vector<4x32xf32>
      tpu.vector_store %arg4[%c0_21, %c0_22], %39 {strides = array<i32>} : memref<4x32xf32, #tpu.memory_space<vmem>>, vector<4x32xf32>,
    } else {
    }
    return
  }
  func.func @transform_0(%arg0: i32, %arg1: i32) -> (i32, i32) {
    %c0_i32 = arith.constant 0 : i32
    %c0_i32_0 = arith.constant 0 : i32
    return %c0_i32, %arg1 : i32, i32
  }
  func.func @transform_1(%arg0: i32, %arg1: i32) -> (i32, i32) {
    %c0_i32 = arith.constant 0 : i32
    return %arg1, %arg0 : i32, i32
  }
  func.func @transform_2(%arg0: i32, %arg1: i32) -> (i32, i32) {
    %c0_i32 = arith.constant 0 : i32
    %c0_i32_0 = arith.constant 0 : i32
    return %c0_i32, %arg0 : i32, i32
  }
}

</mosaic_0001>

<bundles_post_ra>
// kernel: tpu_custom_call.1
= control target key start
LH: loop header
LB: loop body
LE: loop exit
PB: predicated region body
PF: predicated region fallthrough
CT: control target
= control target key end

     0   :  { %v21_v0 = vlaneseq  ;;  %v446_v2 = vmov 0.0|0.0   ;;  %vm18_vm0 = vcmask 3072   ;;  %v447_v8 = vmov 0.0   ;;  %s593_s0 = inlined_call_operand.vmem [shape: s32[1,256], index: 0, kind: input, shape index: {}]   ;;  %s594_s1 = inlined_call_operand.vmem [shape: f32[200,32], index: 1, kind: input, shape index: {}]   ;;  %s595_s2 = inlined_call_operand.hbm [shape: f32[4,32], index: 2, kind: output, shape index: {}]  }
   0x1   :  { %v33_v1 = vld [vmem:[%s594_s1] sm:$0xff]  ;;  %378 = vmatprep.subr.bf16.mxu0 %v446_v2  ;;  %v34_v3 = vld [vmem:[%s594_s1 + $0x8] sm:$0xff]  ;;  %v35_v4 = vld [vmem:[%s594_s1 + $0x10] sm:$0xff]  ;;  %19 = vst.msk [vmem:[#allocation3] sm:$0xf] %vm18_vm0, %v447_v8  ;;  %vm337_vm1 = vcmask 1043456  }
   0x2   :  { %v36_v5 = vld [vmem:[%s594_s1 + $0x18] sm:$0xff]  ;;  %v479_v6 = vshrl.u32 %v21_v0, 7  ;;  %v379_v7 = vpack.c.bf16 %v34_v3, %v33_v1  ;;  %v20_v9 = vld [vmem:[%s593_s0] sm:$0x3]  ;;  %v38_v14 = vld [vmem:[%s594_s1 + $0x28] sm:$0xff]  ;;  %v448_v22 = vmov 1.0  }
   0x3   :  { %v382_v12 = vpack.c.bf16 %v36_v5, %v35_v4  ;;  %v37_v13 = vld [vmem:[%s594_s1 + $0x20] sm:$0xff]  ;;  %v39_v20 = vld [vmem:[%s594_s1 + $0x30] sm:$0xff]  ;;  %v40_v21 = vld [vmem:[%s594_s1 + $0x38] sm:$0xff] }
   0x4   :  { %v25_v10 = vsub.s32 0, %v479_v6  ;;  %v29_v11 = vsub.s32 1, %v479_v6  ;;  %380 = vmatpush1.bf16.msra.mxu0 %v379_v7  ;;  %v385_v17 = vpack.c.bf16 %v38_v14, %v37_v13 }
   0x5   :  { %381 = vmatprep.subr.bf16.mxu0 %v446_v2 }
   0x6   :  { %v495_v15 = vrot.slane %v20_v9, %v25_v10  ;;  %v30_v16 = vrot.slane %v20_v9, %v29_v11 }
   0x8   :  { %vm31_vm2 = vcmp.eq.s32.totalorder %v479_v6, %v495_v15  ;;  %vm32_vm3 = vcmp.eq.s32.totalorder %v479_v6, %v30_v16  ;;  %383 = vmatpush1.bf16.msra.mxu0 %v382_v12 }
   0x9   :  { %v374_v18 = vsel %vm31_vm2, 1.0, %v447_v8  ;;  %v375_v19 = vsel %vm32_vm3, 1.0, %v447_v8  ;;  %384 = vmatprep.subr.bf16.mxu0 %v446_v2  ;;  %376 = vmatprep.mubr.msk.f32.mxu0 %vm32_vm3, %v448_v22 }
   0xa   :  { %7 = vsyncpa [#allocation5], 0  ;;  %v338_v23 = vsel %vm337_vm1, %v374_v18, 0.0  ;;  %v339_v24 = vsel %vm337_vm1, %v375_v19, 0.0  ;;  %v388_v26 = vpack.c.bf16 %v40_v21, %v39_v20  ;;  %v41_v27 = vld [vmem:[%s594_s1 + $0x40] sm:$0xff]  ;;  %v42_v28 = vld [vmem:[%s594_s1 + $0x48] sm:$0xff] }
   0xb   :  { %v340_v25 = vadd.f32 %v339_v24, %v338_v23  ;;  %v391_v29 = vpack.c.bf16 %v42_v28, %v41_v27  ;;  %v43_v30 = vld [vmem:[%s594_s1 + $0x50] sm:$0xff]  ;;  %v44_v31 = vld [vmem:[%s594_s1 + $0x58] sm:$0xff]  ;;  %v45_v33 = vld [vmem:[%s594_s1 + $0x60] sm:$0xff]  ;;  %v449_v41 = vmov 0   ;;  %vm16_vm4 = vcmask 257024  }
   0xc   :  { %386 = vmatpush1.bf16.msra.mxu0 %v385_v17  ;;  %v394_v32 = vpack.c.bf16 %v44_v31, %v43_v30  ;;  %v46_v34 = vld [vmem:[%s594_s1 + $0x68] sm:$0xff]  ;;  %v47_v36 = vld [vmem:[%s594_s1 + $0x70] sm:$0xff]  ;;  %v48_v37 = vld [vmem:[%s594_s1 + $0x78] sm:$0xff]  ;;  %419 = vset.pattern.permute.xlu0 %v449_v41  ;;  %17 = vst.msk [vmem:[#allocation2] sm:$0xf] %vm16_vm4, %v447_v8 }
   0xd   :  { %341 = vadd.xlane.f32.xlu0 %v340_v25  ;;  %387 = vmatprep.subr.bf16.mxu0 %v446_v2  ;;  %v397_v35 = vpack.c.bf16 %v46_v34, %v45_v33  ;;  %v400_v38 = vpack.c.bf16 %v48_v37, %v47_v36  ;;  %v49_v39 = vld [vmem:[%s594_s1 + $0x80] sm:$0xff]  ;;  %v50_v40 = vld [vmem:[%s594_s1 + $0x88] sm:$0xff]  ;;  %v51_v43 = vld [vmem:[%s594_s1 + $0x90] sm:$0xff] }
   0xe   :  { %v403_v42 = vpack.c.bf16 %v50_v40, %v49_v39  ;;  %v52_v44 = vld [vmem:[%s594_s1 + $0x98] sm:$0xff]  ;;  %v53_v46 = vld [vmem:[%s594_s1 + $0xa0] sm:$0xff]  ;;  %v54_v47 = vld [vmem:[%s594_s1 + $0xa8] sm:$0xff] }
   0xf   :  { %v406_v45 = vpack.c.bf16 %v52_v44, %v51_v43  ;;  %v409_v48 = vpack.c.bf16 %v54_v47, %v53_v46  ;;  %v55_v49 = vld [vmem:[%s594_s1 + $0xb0] sm:$0xff]  ;;  %v56_v50 = vld [vmem:[%s594_s1 + $0xb8] sm:$0xff]  ;;  %v57_v52 = vld [vmem:[%s594_s1 + $0xc0] sm:$0xff]  ;;  %s450_s1 = smov [#allocation4]  }
  0x10   :  { %389 = vmatpush1.bf16.msra.mxu0 %v388_v26  ;;  %v412_v51 = vpack.c.bf16 %v56_v50, %v55_v49  ;;  %v336_v53 = vld [vmem:[#allocation3] sm:$0xf]  ;;  %s366_s3 = sshll.u32 %s450_s1, 4  ;;  %s367_s3 = int_to_ptr.vmem [resolvable:$true] %s366_s3 }
  0x11   :  { %390 = vmatprep.subr.bf16.mxu0 %v446_v2  ;;  %s422_s4 = scalar_lea.vmem %s367_s3, 64  ;;  %p427_p1 = scmp.lt.s32.totalorder %s367_s3, %s367_s3 }
  0x12   :  { %p423_p0 = scmp.ne.s32.totalorder %s367_s3, %s422_s4  ;;  %p428_p2 = scmp.lt.s32.totalorder %s422_s4, %s422_s4 }
  0x13   :  { %v258_v58 = vld [vmem:[#allocation2] sm:$0xf] }
  0x14   :  { %392 = vmatpush1.bf16.msra.mxu0 %v391_v29  ;;  %p429_p3 = por %p428_p2, %p427_p1 }
  0x15   :  { %393 = vmatprep.subr.bf16.mxu0 %v446_v2 }
  0x16   :  { %p430_p4 = pnand %p429_p3, %p423_p0 }
  0x18   :  { %395 = vmatpush1.bf16.msra.mxu0 %v394_v32 }
  0x19   :  { %396 = vmatprep.subr.bf16.mxu0 %v446_v2 }
  0x1c   :  { %398 = vmatpush1.bf16.msra.mxu0 %v397_v35 }
  0x1d   :  { %399 = vmatprep.subr.bf16.mxu0 %v446_v2 }
  0x20   :  { %401 = vmatpush1.bf16.msra.mxu0 %v400_v38 }
  0x21   :  { %402 = vmatprep.subr.bf16.mxu0 %v446_v2 }
  0x24   :  { %404 = vmatpush1.bf16.msra.mxu0 %v403_v42 }
  0x25   :  { %405 = vmatprep.subr.bf16.mxu0 %v446_v2 }
  0x28   :  { %407 = vmatpush1.bf16.msra.mxu0 %v406_v45 }
  0x29   :  { %408 = vmatprep.subr.bf16.mxu0 %v446_v2 }
  0x2c   :  { %410 = vmatpush1.bf16.msra.mxu0 %v409_v48 }
  0x2d   :  { %411 = vmatprep.subr.bf16.mxu0 %v446_v2 }
  0x30   :  { %413 = vmatpush1.bf16.msra.mxu0 %v412_v51 }
  0x31   :  { %311 = vmatprep.subr.mxu0 %v447_v8 }
  0x34   :  { %312 = vmatpush1.msra.mxu0 %v57_v52 }
  0x35   :  { %377 = vmatmul.mubr.msk.f32.vlgmr.msra.gmra.mrb[0].mxu0 %vm31_vm2, %v448_v22 }
  0x9a   :  { %v342_v54 = vpop.xlane.xlu0 %341 }
  0x9b   :  { %v343_v55 = vadd.f32 %v342_v54, %v336_v53 }
  0x9d   :  { %345 = vst.msk [vmem:[#allocation3] sm:$0xf] %vm18_vm0, %v343_v55 }
  0xa4   :  { %v349_v56 = vld [vmem:[#allocation3] sm:$0xf] }
  0xa5   :  { %v350_v57 = vmax.f32 %v349_v56, 1.0 }
  0xa7   :  { %354 = vperm.xlu0 %419, %v350_v57  }
 0x108   :  { %v329_v59 = vpop.f32.mrb[0].mxu0 }
 0x109   :  { %v333_v60 = vadd.f32 %v329_v59, %v258_v58  ;;  %v331_v61 = vpop.f32.mrb[1].mxu0 }
 0x10b   :  { %335 = vst.msk [vmem:[#allocation2] sm:$0xf] %vm16_vm4, %v333_v60 }
 0x112   :  { %v351_v63 = vld [vmem:[#allocation2] sm:$0xf] }
 0x126   :  { %v355_v62 = vpop.permute.xlu0 %354 }
 0x127   :  { %420 = vrcp.f32 %v355_v62 }
 0x131   :  { %v421_v0 = vpop.eup %420 }
 0x132   :  { %v358_v1 = vmul.f32 %v421_v0, %v351_v63 }
 0x134   :  { %359 = vst.msk [vmem:[#allocation4] sm:$0xf] %vm16_vm4, %v358_v1 }
 0x135   :  { %433 = shalt.err (!%p430_p4)
}
 0x136   :  { %s434_s7 = scalar_lea.hbm %s595_s2, 64 }
 0x137   :  { %p435_p5 = scmp.ne.s32.totalorder %s595_s2, %s434_s7  ;;  %p438_p6 = scmp.lt.u32.totalorder %s434_s7, %s595_s2 }
 0x139   :  { %p440_p7 = pnand %p438_p6, %p435_p5 }
 0x13b   :  { %443 = shalt.err (!%p440_p7)
}
 0x13c   :  { %369 = dma.vmem_to_hbm [thread:$0]  %s367_s3, 64, %s595_s2, [#allocation5]  }
 0x13d   :  { %444 = dma.done.wait [#allocation5], 64  }
 0x13e   :  { %445 = vsyncadd [#allocation5], 4294967232 }
 0x13f   :  { %373 = vsyncpa [#allocation5], 1 }

</bundles_post_ra>
